<compile_context>
chip_gen: v6e
topology: v6e:2x2x1
jax: 0.10.0
libtpu: 0.0.40
codegen_flags: <defaults>
</compile_context>

<pallas_src>
import jax
import jax.numpy as jnp
from jax import lax
from jax.experimental import pallas as pl
from jax.experimental.pallas import tpu as pltpu


def mlp_kernel(x_ref, w1_ref, b1_ref, w2_ref, b2_ref, w3_ref, b3_ref, o_ref):
    x = x_ref[...]                                                # (TB, F), natural layout

    # Layer 1 (F -> 16) on the MXU.  Contract x's F axis directly ("NT" matmul)
    # so the result is lane-dense (16, TB): batch on the 128-lane axis.
    h1 = lax.dot_general(
        w1_ref[...], x,
        dimension_numbers=(((1,), (1,)), ((), ())),
        preferred_element_type=jnp.float32,
    ) + b1_ref[...]                                               # (16, TB)
    h1 = h1 * h1                                                  # elementwise square (VPU)

    # Layer 2 (16 -> 8) on the MXU, still lane-dense.
    h2 = jnp.dot(w2_ref[...], h1, preferred_element_type=jnp.float32) + b2_ref[...]
    h2 = h2 * h2                                                  # (8, TB)

    # Layer 3 (8 -> 1): VPU broadcast-multiply + XLU sublane reduction.
    # Avoids a third serialized, heavily under-filled MXU push/pop.
    out = jnp.sum(w3_ref[...] * h2, axis=0, keepdims=True) + b3_ref[...]   # (1, TB)

    o_ref[...] = out.astype(o_ref.dtype)


def nn_forward(x, params, *, batch_tile=16 * 1024):
    """x: (B, n_features) f32.  Returns (B, 1) f32 (same as torch)."""
    B, F = x.shape
    w1, b1 = params["w1"], params["b1"]          # (16, F), (16, 1)
    w2, b2 = params["w2"], params["b2"]          # (8, 16), (8, 1)
    w3, b3 = params["w3"], params["b3"]          # (8, 1),  (1, 1)

    # ---- Tile selection ----------------------------------------------------
    # HBM-read-bound kernel (F f32 in / 1 f32 out per sample): make per-step
    # bytes large vs. the fixed per-grid-step cost.  16K rows = 2 MiB of x per
    # step (4 MiB double-buffered at F=32) -> fits every generation's default
    # scoped-VMEM limit with plenty of headroom.
    b_ceil = pl.cdiv(B, 128) * 128               # batch rounded up to lane width
    tb = min(batch_tile, b_ceil)
    # Keep >= 2 grid steps when the batch allows it, so ("parallel",) can shard
    # across both TensorCores on v7x (single extra step is negligible elsewhere).
    if tb == b_ceil and b_ceil >= 256:
        tb = pl.cdiv(b_ceil // 2, 128) * 128
    steps = pl.cdiv(b_ceil, tb)
    b_pad = steps * tb

    # Grid-invariant full blocks for the (tiny) weights/biases: index_map never
    # changes, so they are fetched once and stay resident in VMEM.
    inv = lambda a: pl.BlockSpec(a.shape, lambda i: (0,) * a.ndim)

    yt = pl.pallas_call(
        mlp_kernel,
        out_shape=jax.ShapeDtypeStruct((1, b_pad), jnp.float32),
        grid=(steps,),
        in_specs=[
            pl.BlockSpec((tb, F), lambda i: (i, 0)),              # natural-layout x tile
            inv(w1), inv(b1),
            inv(w2), inv(b2),
            inv(w3), inv(b3),
        ],
        out_specs=pl.BlockSpec((1, tb), lambda i: (0, i)),        # lane-dense output
        compiler_params=pltpu.CompilerParams(
            dimension_semantics=("parallel",),                    # megacore sharding on v7x
        ),
    )(x, w1, b1, w2, b2, w3, b3)

    return yt[:, :B].T                                            # back to torch's (B, 1)


def init_params(key, n_features):
    """Deterministic init matching torch.nn.Linear's U(-1/sqrt(fan_in), +1/sqrt(fan_in))."""
    # (suffix, weight shape, bias shape, fan_in)
    layers = [
        ("1", (16, n_features), (16, 1), n_features),   # stored (out, in), torch-style
        ("2", (8, 16),          (8, 1),  16),
        ("3", (8, 1),           (1, 1),  8),            # layer-3 weight stored as (in, out) column
    ]
    params = {}
    for name, wshape, bshape, fan_in in layers:
        key, kw, kb = jax.random.split(key, 3)
        bound = float(fan_in) ** -0.5
        params[f"w{name}"] = jax.random.uniform(kw, wshape, jnp.float32, -bound, bound)
        params[f"b{name}"] = jax.random.uniform(kb, bshape, jnp.float32, -bound, bound)
    return params


def reference_forward(x, p):
    h1 = x @ p["w1"].T + p["b1"].T
    h1 = h1 * h1
    h2 = h1 @ p["w2"].T + p["b2"].T
    h2 = h2 * h2
    return h2 @ p["w3"] + p["b3"].T


if __name__ == "__main__":
    n_features = 32
    batch = 8

    key = jax.random.PRNGKey(0)
    key, kx = jax.random.split(key)
    x = jax.random.normal(kx, (batch, n_features), dtype=jnp.float32)
    params = init_params(key, n_features)

    out = nn_forward(x, params)
    jax.block_until_ready(out)

    ref = reference_forward(x, params)
    assert out.shape == (batch, 1)
    assert jnp.allclose(out, ref, atol=1e-5, rtol=1e-5), float(jnp.max(jnp.abs(out - ref)))

    print("KERNEL_OK")
</pallas_src>

<mosaic_0001>
module attributes {stable_mosaic.version = 11 : i64} {
  func.func @mlp_kernel(%arg0: i32, %arg1: memref<128x32xf32, #tpu.memory_space<vmem>>, %arg2: memref<16x32xf32, #tpu.memory_space<vmem>>, %arg3: memref<16x1xf32, #tpu.memory_space<vmem>>, %arg4: memref<8x16xf32, #tpu.memory_space<vmem>>, %arg5: memref<8x1xf32, #tpu.memory_space<vmem>>, %arg6: memref<8x1xf32, #tpu.memory_space<vmem>>, %arg7: memref<1x1xf32, #tpu.memory_space<vmem>>, %arg8: memref<1x128xf32, #tpu.memory_space<vmem>>) attributes {dimension_semantics = [#tpu.dimension_semantics<parallel>], iteration_bounds = array<i64: 1>, scalar_prefetch = 0 : i64, scratch_operands = 0 : i64, tpu.core_type = #tpu.core_type<tc>, window_params = [{transform_indices = @transform_0, window_bounds = array<i64: 128, 32>}, {pipeline_mode = #tpu.pipeline_mode<synchronous>, transform_indices = @transform_1, window_bounds = array<i64: 16, 32>}, {pipeline_mode = #tpu.pipeline_mode<synchronous>, transform_indices = @transform_2, window_bounds = array<i64: 16, 1>}, {pipeline_mode = #tpu.pipeline_mode<synchronous>, transform_indices = @transform_3, window_bounds = array<i64: 8, 16>}, {pipeline_mode = #tpu.pipeline_mode<synchronous>, transform_indices = @transform_4, window_bounds = array<i64: 8, 1>}, {pipeline_mode = #tpu.pipeline_mode<synchronous>, transform_indices = @transform_5, window_bounds = array<i64: 8, 1>}, {pipeline_mode = #tpu.pipeline_mode<synchronous>, transform_indices = @transform_6, window_bounds = array<i64: 1, 1>}, {transform_indices = @transform_7, window_bounds = array<i64: 1, 128>}]} {
    %c0 = arith.constant 0 : index
    %c0_0 = arith.constant 0 : index
    %0 = vector.load %arg1[%c0, %c0_0] : memref<128x32xf32, #tpu.memory_space<vmem>>, vector<128x32xf32>
    %c0_1 = arith.constant 0 : index
    %c0_2 = arith.constant 0 : index
    %1 = vector.load %arg2[%c0_1, %c0_2] : memref<16x32xf32, #tpu.memory_space<vmem>>, vector<16x32xf32>
    %cst = arith.constant dense<0.000000e+00> : vector<16x128xf32>
    %2 = tpu.matmul %1, %0, %cst {dimension_numbers = #tpu.dot_dimension_numbers<[1], [1], [0], [0], [0, 0, 1, 0], [], []>} : vector<16x32xf32>, vector<128x32xf32>, vector<16x128xf32> -> vector<16x128xf32>
    %c0_3 = arith.constant 0 : index
    %c0_4 = arith.constant 0 : index
    %3 = vector.load %arg3[%c0_3, %c0_4] : memref<16x1xf32, #tpu.memory_space<vmem>>, vector<16x1xf32>
    %4 = vector.broadcast %3 : vector<16x1xf32> to vector<16x128xf32>
    %5 = arith.addf %2, %4 : vector<16x128xf32>
    %6 = arith.mulf %5, %5 : vector<16x128xf32>
    %c0_5 = arith.constant 0 : index
    %c0_6 = arith.constant 0 : index
    %7 = vector.load %arg4[%c0_5, %c0_6] : memref<8x16xf32, #tpu.memory_space<vmem>>, vector<8x16xf32>
    %cst_7 = arith.constant dense<0.000000e+00> : vector<8x128xf32>
    %8 = tpu.matmul %7, %6, %cst_7 {dimension_numbers = #tpu.dot_dimension_numbers<[1], [0], [0], [1], [0, 0, 1, 1], [], []>} : vector<8x16xf32>, vector<16x128xf32>, vector<8x128xf32> -> vector<8x128xf32>
    %c0_8 = arith.constant 0 : index
    %c0_9 = arith.constant 0 : index
    %9 = vector.load %arg5[%c0_8, %c0_9] : memref<8x1xf32, #tpu.memory_space<vmem>>, vector<8x1xf32>
    %10 = vector.broadcast %9 : vector<8x1xf32> to vector<8x128xf32>
    %11 = arith.addf %8, %10 : vector<8x128xf32>
    %12 = arith.mulf %11, %11 : vector<8x128xf32>
    %c0_10 = arith.constant 0 : index
    %c0_11 = arith.constant 0 : index
    %13 = vector.load %arg6[%c0_10, %c0_11] : memref<8x1xf32, #tpu.memory_space<vmem>>, vector<8x1xf32>
    %14 = vector.broadcast %13 : vector<8x1xf32> to vector<8x128xf32>
    %15 = arith.mulf %14, %12 : vector<8x128xf32>
    %cst_12 = arith.constant dense<0.000000e+00> : vector<128xf32>
    %16 = vector.multi_reduction <add>, %15, %cst_12 [0] : vector<8x128xf32> to vector<128xf32>
    %17 = vector.shape_cast %16 : vector<128xf32> to vector<1x128xf32>
    %c0_13 = arith.constant 0 : index
    %c0_14 = arith.constant 0 : index
    %18 = vector.load %arg7[%c0_13, %c0_14] : memref<1x1xf32, #tpu.memory_space<vmem>>, vector<1x1xf32>
    %19 = vector.broadcast %18 : vector<1x1xf32> to vector<1x128xf32>
    %20 = arith.addf %17, %19 : vector<1x128xf32>
    %c0_15 = arith.constant 0 : index
    %c0_16 = arith.constant 0 : index
    %21 = vector.load %arg8[%c0_15, %c0_16] : memref<1x128xf32, #tpu.memory_space<vmem>>, vector<1x128xf32>
    tpu.vector_store %arg8[%c0_15, %c0_16], %20 {strides = array<i32>} : memref<1x128xf32, #tpu.memory_space<vmem>>, vector<1x128xf32>,
    return
  }
  func.func @transform_0(%arg0: i32) -> (i32, i32) {
    %c0_i32 = arith.constant 0 : i32
    %c0_i32_0 = arith.constant 0 : i32
    return %arg0, %c0_i32 : i32, i32
  }
  func.func @transform_1(%arg0: i32) -> (i32, i32) {
    %c0_i32 = arith.constant 0 : i32
    %c0_i32_0 = arith.constant 0 : i32
    %c0_i32_1 = arith.constant 0 : i32
    return %c0_i32, %c0_i32_0 : i32, i32
  }
  func.func @transform_2(%arg0: i32) -> (i32, i32) {
    %c0_i32 = arith.constant 0 : i32
    %c0_i32_0 = arith.constant 0 : i32
    %c0_i32_1 = arith.constant 0 : i32
    return %c0_i32, %c0_i32_0 : i32, i32
  }
  func.func @transform_3(%arg0: i32) -> (i32, i32) {
    %c0_i32 = arith.constant 0 : i32
    %c0_i32_0 = arith.constant 0 : i32
    %c0_i32_1 = arith.constant 0 : i32
    return %c0_i32, %c0_i32_0 : i32, i32
  }
  func.func @transform_4(%arg0: i32) -> (i32, i32) {
    %c0_i32 = arith.constant 0 : i32
    %c0_i32_0 = arith.constant 0 : i32
    %c0_i32_1 = arith.constant 0 : i32
    return %c0_i32, %c0_i32_0 : i32, i32
  }
  func.func @transform_5(%arg0: i32) -> (i32, i32) {
    %c0_i32 = arith.constant 0 : i32
    %c0_i32_0 = arith.constant 0 : i32
    %c0_i32_1 = arith.constant 0 : i32
    return %c0_i32, %c0_i32_0 : i32, i32
  }
  func.func @transform_6(%arg0: i32) -> (i32, i32) {
    %c0_i32 = arith.constant 0 : i32
    %c0_i32_0 = arith.constant 0 : i32
    %c0_i32_1 = arith.constant 0 : i32
    return %c0_i32, %c0_i32_0 : i32, i32
  }
  func.func @transform_7(%arg0: i32) -> (i32, i32) {
    %c0_i32 = arith.constant 0 : i32
    %c0_i32_0 = arith.constant 0 : i32
    return %c0_i32, %arg0 : i32, i32
  }
}

</mosaic_0001>

<bundles_post_ra>
// kernel: tpu_custom_call.1
= control target key start
LH: loop header
LB: loop body
LE: loop exit
PB: predicated region body
PF: predicated region fallthrough
CT: control target
= control target key end

     0   :  { %s575_s0 = inlined_call_operand.vmem [shape: f32[8,32], index: 0, kind: input, shape index: {}]   ;;  %s576_s1 = inlined_call_operand.vmem [shape: f32[16,32], index: 1, kind: input, shape index: {}]   ;;  %s577_s2 = inlined_call_operand.vmem [shape: f32[16,1], index: 2, kind: input, shape index: {}]   ;;  %s578_s3 = inlined_call_operand.vmem [shape: f32[8,16], index: 3, kind: input, shape index: {}]   ;;  %s579_s4 = inlined_call_operand.vmem [shape: f32[8,1], index: 4, kind: input, shape index: {}]   ;;  %s580_s5 = inlined_call_operand.vmem [shape: f32[8,1], index: 5, kind: input, shape index: {}]   ;;  %s581_s6 = inlined_call_operand.<no memory space> [shape: f32[1,1], index: 6, kind: input, shape index: {}]   ;;  %s582_s7 = inlined_call_operand.hbm [shape: f32[1,128], index: 7, kind: output, shape index: {}]  }
   0x1   :  { %v12_v0 = vstv %s581_s6 }
   0x2   :  { %13 = vst [vmem:[#allocation2] sm:$0x1] %v12_v0 }
   0x3   :  { %v44_v1 = vld [vmem:[%s575_s0 + $0x78] sm:$0xff]  ;;  %vm59_vm0 = vcmask 261120   ;;  %v43_v2 = vld [vmem:[%s575_s0 + $0x70] sm:$0xff]  ;;  %v422_v3 = vmov 0   ;;  %v42_v4 = vld [vmem:[%s575_s0 + $0x68] sm:$0xff] }
   0x4   :  { %352 = vmatprep.subr.msk.mxu0 %vm59_vm0, %v44_v1  ;;  %398 = vset.pattern.permute.xlu0 %v422_v3  ;;  %v45_v5 = vld [vmem:[%s576_s1] sm:$0xff]  ;;  %v48_v6 = vld [vmem:[%s577_s2 + $0x8] sm:$0xff] }
   0x5   :  { %353 = vmatpush3.xpose.msk.msra.mxu0 %vm59_vm0, %v44_v1  ;;  %399 = vset.pattern.permute.xlu1 %v422_v3 }
   0x6   :  { %354 = vmatprep.subr.msk.mxu0 %vm59_vm0, %v43_v2  ;;  %384 = vmatprep.mubr.msk.f32.mxu0 %vm59_vm0, %v45_v5 }
   0x7   :  { %56 = vperm.xlu0 %398, %v48_v6  }
   0x9   :  { %355 = vmatpush3.xpose.msk.msra.mxu0 %vm59_vm0, %v43_v2 }
   0xa   :  { %356 = vmatprep.subr.msk.mxu0 %vm59_vm0, %v42_v4 }
   0xb   :  { %14 = vsyncpa [#allocation4], 0  ;;  %v41_v7 = vld [vmem:[%s575_s0 + $0x60] sm:$0xff]  ;;  %v40_v9 = vld [vmem:[%s575_s0 + $0x58] sm:$0xff]  ;;  %v423_v23 = vmov 0.0   ;;  %vm424_vm1 = vmmov 0   ;;  %v292_v41 = vlaneseq }
   0xc   :  { %v47_v8 = vld [vmem:[%s577_s2] sm:$0xff]  ;;  %v39_v11 = vld [vmem:[%s575_s0 + $0x50] sm:$0xff]  ;;  %v38_v12 = vld [vmem:[%s575_s0 + $0x48] sm:$0xff]  ;;  %387 = vmatprep.subr.mxu1 %v423_v23  ;;  %391 = vmatprep.mubr.msk.f32.mxu1 %vm424_vm1, %v423_v23  ;;  %vm198_vm2 = vcmask 130048  }
   0xd   :  { %357 = vmatpush3.xpose.msk.msra.mxu0 %vm59_vm0, %v42_v4  ;;  %51 = vperm.xlu0 %398, %v47_v8   ;;  %v286_v10 = vld [vmem:[#allocation2] sm:$0x1]  ;;  %v36_v14 = vld [vmem:[%s575_s0 + $0x38] sm:$0xff]  ;;  %v35_v15 = vld [vmem:[%s575_s0 + $0x30] sm:$0xff]  ;;  %v293_v44 = vshrl.u32 %v292_v41, 7 }
   0xe   :  { %358 = vmatprep.subr.msk.mxu0 %vm59_vm0, %v41_v7  ;;  %v37_v13 = vld [vmem:[%s575_s0 + $0x40] sm:$0xff]  ;;  %v34_v16 = vld [vmem:[%s575_s0 + $0x28] sm:$0xff]  ;;  %v32_v18 = vld [vmem:[%s575_s0 + $0x18] sm:$0xff] }
   0xf   :  { %v33_v17 = vld [vmem:[%s575_s0 + $0x20] sm:$0xff]  ;;  %v31_v19 = vld [vmem:[%s575_s0 + $0x10] sm:$0xff]  ;;  %v30_v20 = vld [vmem:[%s575_s0 + $0x8] sm:$0xff]  ;;  %v294_v47 = vsub.s32 0, %v293_v44 }
  0x10   :  { %v29_v21 = vld [vmem:[%s575_s0] sm:$0xff]  ;;  %v46_v22 = vld [vmem:[%s576_s1 + $0x8] sm:$0xff] }
  0x11   :  { %359 = vmatpush3.xpose.msk.msra.mxu0 %vm59_vm0, %v41_v7  ;;  %289 = vperm.xlu0 %398, %v286_v10   ;;  %v192_v24 = vld [vmem:[%s579_s4] sm:$0xff] }
  0x12   :  { %360 = vmatprep.subr.msk.mxu0 %vm59_vm0, %v40_v9  ;;  %195 = vperm.xlu1 %399, %v192_v24   ;;  %v273_v25 = vld [vmem:[%s580_s5] sm:$0xff] }
  0x13   :  { %v191_v34 = vld [vmem:[%s578_s3] sm:$0xff]  ;;  %s425_s3 = smov [#allocation3]  }
  0x14   :  { %s304_s4 = sshll.u32 %s425_s3, 4  ;;  %s305_s4 = int_to_ptr.vmem [resolvable:$true] %s304_s4 }
  0x15   :  { %361 = vmatpush3.xpose.msk.msra.mxu0 %vm59_vm0, %v40_v9  ;;  %s400_s5 = scalar_lea.vmem %s305_s4, 16  ;;  %s404_s20 = scalar_lea.vmem %s305_s4, 32 }
  0x16   :  { %362 = vmatprep.subr.msk.mxu0 %vm59_vm0, %v39_v11  ;;  %276 = vperm.xlu1 %399, %v273_v25   ;;  %p401_p0 = scmp.ne.s32.totalorder %s305_s4, %s400_s5  ;;  %p405_p1 = scmp.lt.s32.totalorder %s305_s4, %s305_s4 }
  0x17   :  { %p406_p2 = scmp.lt.s32.totalorder %s404_s20, %s400_s5 }
  0x19   :  { %363 = vmatpush3.xpose.msk.msra.mxu0 %vm59_vm0, %v39_v11  ;;  %p407_p3 = por %p406_p2, %p405_p1 }
  0x1a   :  { %364 = vmatprep.subr.msk.mxu0 %vm59_vm0, %v38_v12 }
  0x1b   :  { %p408_p4 = pnand %p407_p3, %p401_p0 }
  0x1d   :  { %365 = vmatpush3.xpose.msk.msra.mxu0 %vm59_vm0, %v38_v12 }
  0x1e   :  { %366 = vmatprep.subr.msk.mxu0 %vm59_vm0, %v37_v13 }
  0x21   :  { %367 = vmatpush3.xpose.msk.msra.mxu0 %vm59_vm0, %v37_v13 }
  0x22   :  { %368 = vmatprep.subr.msk.mxu0 %vm59_vm0, %v36_v14 }
  0x25   :  { %369 = vmatpush3.xpose.msk.msra.mxu0 %vm59_vm0, %v36_v14 }
  0x26   :  { %370 = vmatprep.subr.msk.mxu0 %vm59_vm0, %v35_v15 }
  0x29   :  { %371 = vmatpush3.xpose.msk.msra.mxu0 %vm59_vm0, %v35_v15 }
  0x2a   :  { %372 = vmatprep.subr.msk.mxu0 %vm59_vm0, %v34_v16 }
  0x2d   :  { %373 = vmatpush3.xpose.msk.msra.mxu0 %vm59_vm0, %v34_v16 }
  0x2e   :  { %374 = vmatprep.subr.msk.mxu0 %vm59_vm0, %v33_v17 }
  0x31   :  { %375 = vmatpush3.xpose.msk.msra.mxu0 %vm59_vm0, %v33_v17 }
  0x32   :  { %376 = vmatprep.subr.msk.mxu0 %vm59_vm0, %v32_v18 }
  0x35   :  { %377 = vmatpush3.xpose.msk.msra.mxu0 %vm59_vm0, %v32_v18 }
  0x36   :  { %378 = vmatprep.subr.msk.mxu0 %vm59_vm0, %v31_v19 }
  0x39   :  { %379 = vmatpush3.xpose.msk.msra.mxu0 %vm59_vm0, %v31_v19 }
  0x3a   :  { %380 = vmatprep.subr.msk.mxu0 %vm59_vm0, %v30_v20 }
  0x3d   :  { %381 = vmatpush3.xpose.msk.msra.mxu0 %vm59_vm0, %v30_v20 }
  0x3e   :  { %382 = vmatprep.subr.msk.mxu0 %vm59_vm0, %v29_v21 }
  0x41   :  { %383 = vmatpush3.xpose.msk.msra.mxu0 %vm59_vm0, %v29_v21 }
  0x44   :  { %385 = vmatmul.mubr.msk.f32.vlgmr.msra.gmra.mxu0 %vm59_vm0, %v46_v22 }
  0x82   :  { %v57_v26 = vpop.permute.xlu0 %56 }
  0x88   :  { %v52_v29 = vpop.permute.xlu0 %51 }
  0x8c   :  { %v290_v49 = vpop.permute.xlu0 %289 }
  0x8d   :  { %v196_v35 = vpop.permute.xlu1 %195  ;;  %v295_v51 = vrot.slane %v290_v49, %v294_v47 }
  0x91   :  { %v277_v40 = vpop.permute.xlu1 %276 }
 0x104   :  { %v386_v27 = vpop.f32.mrf.mxu0 }
 0x105   :  { %v186_v28 = vadd.f32 %v386_v27, %v57_v26 }
 0x106   :  { %v180_v30 = vpop.f32.mrf.mxu0 }
 0x107   :  { %v190_v31 = vmul.f32 %v186_v28, %v186_v28  ;;  %v181_v32 = vadd.f32 %v180_v30, %v52_v29 }
 0x109   :  { %v189_v33 = vmul.f32 %v181_v32, %v181_v32  ;;  %388 = vmatpush3.msra.mxu1 %v190_v31 }
 0x10a   :  { %389 = vmatprep.subr.mxu1 %v423_v23 }
 0x10b   :  { %390 = vmatpush3.msra.mxu1 %v189_v33 }
 0x10c   :  { %392 = vmatmul.mubr.msk.f32.vlgmr.msra.gmra.mxu1 %vm198_vm2, %v191_v34 }
 0x1cc   :  { %v268_v36 = vpop.f32.mrf.mxu1 }
 0x1cd   :  { %v269_v37 = vadd.f32 %v268_v36, %v196_v35 }
 0x1ce   :  { %v393_v38 = vpop.f32.mrf.mxu1 }
 0x1cf   :  { %v272_v39 = vmul.f32 %v269_v37, %v269_v37 }
 0x1d1   :  { %v279_v42 = vmul.f32 %v277_v40, %v272_v39 }
 0x1d3   :  { %v280_v43 = vrot.slane %v279_v42, 4 }
 0x1d5   :  { %v281_v45 = vadd.f32 %v280_v43, %v279_v42 }
 0x1d7   :  { %v282_v46 = vrot.slane %v281_v45, 2 }
 0x1d9   :  { %v283_v48 = vadd.f32 %v282_v46, %v281_v45 }
 0x1db   :  { %v284_v50 = vrot.slane %v283_v48, 1 }
 0x1dd   :  { %v285_v52 = vadd.f32 %v284_v50, %v283_v48 }
 0x1df   :  { %v296_v53 = vadd.f32 %v295_v51, %v285_v52 }
 0x1e1   :  { %297 = vst [vmem:[#allocation3] sm:$0x1] %v296_v53 }
 0x1e2   :  { %411 = shalt.err (!%p408_p4)
}
 0x1e3   :  { %307 = dma.vmem_to_hbm [thread:$0]  %s305_s4, 16, %s582_s7, [#allocation4]  }
 0x1e4   :  { %420 = dma.done.wait [#allocation4], 16  }
 0x1e5   :  { %421 = vsyncadd [#allocation4], 4294967280 }
 0x1e6   :  { %311 = vsyncpa [#allocation4], 1 }

</bundles_post_ra>
